<compile_context>
chip_gen: v7x
topology: tpu7x:2x2x1
jax: 0.10.0
libtpu: 0.0.40
codegen_flags: <defaults>
</compile_context>

<pallas_src>
from functools import partial

import jax
import jax.numpy as jnp
from jax.experimental import pallas as pl
from jax.experimental.pallas import tpu as pltpu


def _attention_kernel(x_ref, wq_ref, wk_ref, wv_ref, bq_ref, bv_ref,
                      wp_ref, bp_ref, o_ref, acc_ref):
    """One grid step == (batch b, head h).

    x_ref  : (1, N, C)     input tokens for batch b
    wq_ref : (1, C, hd)    per-head Q weight, pre-transposed, pre-scaled by `scale`
    wk_ref : (1, C, hd)    per-head K weight, pre-transposed
    wv_ref : (1, C, hd)    per-head V weight, pre-transposed
    bq_ref : (1, 1, hd)    per-head Q bias (pre-scaled), f32
    bv_ref : (1, 1, hd)    per-head V bias, f32
    wp_ref : (1, hd, C)    per-head slice of output-projection weight
    bp_ref : (1, C)        output-projection bias, f32
    o_ref  : (1, N, C)     output tokens for batch b
    acc_ref: (N, C) f32    VMEM scratch accumulator over heads
    """
    h = pl.program_id(1)
    last_h = pl.num_programs(1) - 1

    x = x_ref[0]                       # (N, C) in x.dtype
    in_dt = x.dtype

    # ---- per-head QKV projection: x.dtype operands, f32 accumulation (MXU) ----
    q = jnp.dot(x, wq_ref[0], preferred_element_type=jnp.float32) + bq_ref[0]
    k = jnp.dot(x, wk_ref[0], preferred_element_type=jnp.float32)
    v = jnp.dot(x, wv_ref[0], preferred_element_type=jnp.float32) + bv_ref[0]
    q = q.astype(in_dt)                # matmul operands back in x.dtype
    k = k.astype(in_dt)
    v = v.astype(in_dt)

    # ---- qk_float=True: logits & softmax in f32 (operands stay x.dtype) ----
    logits = jax.lax.dot_general(q, k, (((1,), (1,)), ((), ())),
                                 preferred_element_type=jnp.float32)      # (N, N)
    m = jnp.max(logits, axis=-1, keepdims=True)
    e = jnp.exp(logits - m)
    denom = jnp.sum(e, axis=-1, keepdims=True)
    p = (e * pl.reciprocal(denom, approx=True)).astype(in_dt)             # (N, N)

    # ---- attn @ v  (x.dtype operands, f32 acc) ----
    o_h = jnp.dot(p, v, preferred_element_type=jnp.float32).astype(in_dt)  # (N, hd)

    # ---- per-head output-projection contribution (no lane-axis concat) ----
    y_h = jnp.dot(o_h, wp_ref[0], preferred_element_type=jnp.float32)      # (N, C)

    @pl.when(h == 0)
    def _init():
        acc_ref[...] = jnp.zeros_like(acc_ref)

    acc_ref[...] += y_h

    @pl.when(h == last_h)
    def _finalize():
        o_ref[0] = (acc_ref[...] + bp_ref[...]).astype(o_ref.dtype)


def prepare_attention_params(wqkv, q_bias, v_bias, wproj, bproj, *,
                             num_heads, scale=None):
    """One-time weight preparation (do NOT redo per call).

    wqkv  : (3*D, C_in)  torch nn.Linear weight layout (out, in)
    q_bias: (D,)   v_bias: (D,)
    wproj : (C_out, D)   torch layout (out, in)
    bproj : (C_out,)
    """
    D3, C_in = wqkv.shape
    D = D3 // 3
    hd = D // num_heads
    C_out = wproj.shape[0]
    if scale is None:
        scale = hd ** (-0.5)
    scale = jnp.float32(scale)

    wq = wqkv[:D].reshape(num_heads, hd, C_in)
    wk = wqkv[D:2 * D].reshape(num_heads, hd, C_in)
    wv = wqkv[2 * D:].reshape(num_heads, hd, C_in)
    # (H, C_in, hd) so the kernel does x @ W; fold `scale` into Wq / q_bias.
    wq_t = (jnp.transpose(wq, (0, 2, 1)) * scale).astype(wqkv.dtype)
    wk_t = jnp.transpose(wk, (0, 2, 1))
    wv_t = jnp.transpose(wv, (0, 2, 1))
    bq = (q_bias.astype(jnp.float32) * scale).reshape(num_heads, 1, hd)
    bv = v_bias.astype(jnp.float32).reshape(num_heads, 1, hd)
    # per-head slice of proj^T : (H, hd, C_out)
    wp_t = jnp.transpose(wproj.reshape(C_out, num_heads, hd), (1, 2, 0))
    bp = bproj.astype(jnp.float32).reshape(1, C_out)
    return (wq_t, wk_t, wv_t, bq, bv, wp_t, bp)


def attention_forward(x, params):
    """Pallas-backed Attention.forward (eval mode, no masks / rel-pos bias)."""
    wq_t, wk_t, wv_t, bq, bv, wp_t, bp = params
    B, N, C_in = x.shape
    H, _, hd = wq_t.shape
    C_out = wp_t.shape[-1]

    return pl.pallas_call(
        _attention_kernel,
        out_shape=jax.ShapeDtypeStruct((B, N, C_out), x.dtype),
        grid_spec=pltpu.PrefetchScalarGridSpec(
            num_scalar_prefetch=0,
            grid=(B, H),
            in_specs=[
                pl.BlockSpec((1, N, C_in), lambda b, h: (b, 0, 0)),    # x
                pl.BlockSpec((1, C_in, hd), lambda b, h: (h, 0, 0)),   # Wq (scaled)
                pl.BlockSpec((1, C_in, hd), lambda b, h: (h, 0, 0)),   # Wk
                pl.BlockSpec((1, C_in, hd), lambda b, h: (h, 0, 0)),   # Wv
                pl.BlockSpec((1, 1, hd), lambda b, h: (h, 0, 0)),      # q bias (scaled)
                pl.BlockSpec((1, 1, hd), lambda b, h: (h, 0, 0)),      # v bias
                pl.BlockSpec((1, hd, C_out), lambda b, h: (h, 0, 0)),  # Wproj slice
                pl.BlockSpec((1, C_out), lambda b, h: (0, 0)),         # proj bias
            ],
            out_specs=pl.BlockSpec((1, N, C_out), lambda b, h: (b, 0, 0)),
            scratch_shapes=[pltpu.VMEM((N, C_out), jnp.float32)],
        ),
        compiler_params=pltpu.CompilerParams(
            dimension_semantics=("parallel", "arbitrary"),
            vmem_limit_bytes=32 * 1024 * 1024,
        ),
    )(x, wq_t, wk_t, wv_t, bq, bv, wp_t, bp)


def _reference_forward(x, wqkv, q_bias, v_bias, wproj, bproj, *,
                       num_heads, scale=None):
    """Pure-JAX mirror of the PyTorch forward, for correctness checking."""
    B, N, C = x.shape
    D = wqkv.shape[0] // 3
    head_dim = D // num_heads
    if scale is None:
        scale = head_dim ** (-0.5)
    qkv_bias = jnp.concatenate([q_bias, jnp.zeros_like(v_bias), v_bias])
    qkv = x @ wqkv.T + qkv_bias                                    # (B, N, 3D)
    qkv = qkv.reshape(B, N, 3, num_heads, head_dim).transpose(2, 0, 3, 1, 4)
    q, k, v = qkv[0], qkv[1], qkv[2]                               # (B, H, N, hd)
    q = q * scale
    attn = jnp.einsum('bhnd,bhmd->bhnm',
                      q.astype(jnp.float32), k.astype(jnp.float32))
    attn = jax.nn.softmax(attn, axis=-1).astype(x.dtype)
    out = jnp.einsum('bhnm,bhmd->bhnd', attn, v)                   # (B, H, N, hd)
    out = out.transpose(0, 2, 1, 3).reshape(B, N, D)
    return out @ wproj.T + bproj


if __name__ == "__main__":
    # Small config consistent with the module: dim=32, num_heads=4, head_dim=8.
    B, N, C = 2, 8, 32
    num_heads = 4
    D = C  # attn_head_dim=None -> all_head_dim == dim

    key = jax.random.PRNGKey(0)
    kx, kw1, kb1q, kb1v, kw2, kb2 = jax.random.split(key, 6)

    x = jax.random.normal(kx, (B, N, C), dtype=jnp.float32)
    wqkv = jax.random.normal(kw1, (3 * D, C), dtype=jnp.float32) * 0.05
    # Module initializes q_bias / v_bias to zeros; use small nonzero values so
    # the bias path is exercised (synthetic deterministic init).
    q_bias = jax.random.normal(kb1q, (D,), dtype=jnp.float32) * 0.02
    v_bias = jax.random.normal(kb1v, (D,), dtype=jnp.float32) * 0.02
    wproj = jax.random.normal(kw2, (C, D), dtype=jnp.float32) * 0.05
    bproj = jax.random.normal(kb2, (C,), dtype=jnp.float32) * 0.02

    # One-time weight prep, then jit the Pallas forward.
    params = prepare_attention_params(wqkv, q_bias, v_bias, wproj, bproj,
                                      num_heads=num_heads)
    params = jax.tree_util.tree_map(jax.block_until_ready, params)
    fwd = jax.jit(attention_forward)

    out = fwd(x, params)
    out = jax.block_until_ready(out)

    ref = _reference_forward(x, wqkv, q_bias, v_bias, wproj, bproj,
                             num_heads=num_heads)
    assert out.shape == (B, N, C)
    # Tolerance accounts for the EUP approximate-reciprocal softmax denominator.
    assert jnp.allclose(out, ref, atol=2e-3, rtol=2e-3), "mismatch vs reference"

    # TODO(synk): optional rel_pos_bias / attn_mask / window_size relative-position
    # table paths are not exercised (module defaults: all None / disabled).
    print("KERNEL_OK")
</pallas_src>

<mosaic_0001>
module attributes {stable_mosaic.version = 11 : i64} {
  func.func @_attention_kernel(%arg0: i32, %arg1: i32, %arg2: memref<1x8x32xf32, #tpu.memory_space<vmem>>, %arg3: memref<1x32x8xf32, #tpu.memory_space<vmem>>, %arg4: memref<1x32x8xf32, #tpu.memory_space<vmem>>, %arg5: memref<1x32x8xf32, #tpu.memory_space<vmem>>, %arg6: memref<1x1x8xf32, #tpu.memory_space<vmem>>, %arg7: memref<1x1x8xf32, #tpu.memory_space<vmem>>, %arg8: memref<1x8x32xf32, #tpu.memory_space<vmem>>, %arg9: memref<1x32xf32, #tpu.memory_space<vmem>>, %arg10: memref<1x8x32xf32, #tpu.memory_space<vmem>>, %arg11: memref<8x32xf32, #tpu.memory_space<vmem>>) attributes {dimension_semantics = [#tpu.dimension_semantics<parallel>, #tpu.dimension_semantics<arbitrary>], iteration_bounds = array<i64: 2, 4>, scalar_prefetch = 0 : i64, scratch_operands = 1 : i64, tpu.core_type = #tpu.core_type<tc>, window_params = [{transform_indices = @transform_0, window_bounds = array<i64: 1, 8, 32>}, {transform_indices = @transform_1, window_bounds = array<i64: 1, 32, 8>}, {transform_indices = @transform_2, window_bounds = array<i64: 1, 32, 8>}, {transform_indices = @transform_3, window_bounds = array<i64: 1, 32, 8>}, {transform_indices = @transform_4, window_bounds = array<i64: 1, 1, 8>}, {transform_indices = @transform_5, window_bounds = array<i64: 1, 1, 8>}, {transform_indices = @transform_6, window_bounds = array<i64: 1, 8, 32>}, {pipeline_mode = #tpu.pipeline_mode<synchronous>, transform_indices = @transform_7, window_bounds = array<i64: 1, 32>}, {transform_indices = @transform_8, window_bounds = array<i64: 1, 8, 32>}]} {
    %c0 = arith.constant 0 : index
    %c0_0 = arith.constant 0 : index
    %c0_1 = arith.constant 0 : index
    %0 = vector.load %arg2[%c0, %c0_0, %c0_1] : memref<1x8x32xf32, #tpu.memory_space<vmem>>, vector<1x8x32xf32>
    %1 = vector.shape_cast %0 : vector<1x8x32xf32> to vector<8x32xf32>
    %c0_2 = arith.constant 0 : index
    %c0_3 = arith.constant 0 : index
    %c0_4 = arith.constant 0 : index
    %2 = vector.load %arg3[%c0_2, %c0_3, %c0_4] : memref<1x32x8xf32, #tpu.memory_space<vmem>>, vector<1x32x8xf32>
    %3 = vector.shape_cast %2 : vector<1x32x8xf32> to vector<32x8xf32>
    %cst = arith.constant dense<0.000000e+00> : vector<8x8xf32>
    %4 = tpu.matmul %1, %3, %cst {dimension_numbers = #tpu.dot_dimension_numbers<[1], [0], [0], [1], [0, 0, 1, 1], [], []>} : vector<8x32xf32>, vector<32x8xf32>, vector<8x8xf32> -> vector<8x8xf32>
    %c0_5 = arith.constant 0 : index
    %c0_6 = arith.constant 0 : index
    %c0_7 = arith.constant 0 : index
    %5 = vector.load %arg6[%c0_5, %c0_6, %c0_7] : memref<1x1x8xf32, #tpu.memory_space<vmem>>, vector<1x1x8xf32>
    %6 = vector.shape_cast %5 : vector<1x1x8xf32> to vector<1x8xf32>
    %7 = vector.broadcast %6 : vector<1x8xf32> to vector<8x8xf32>
    %8 = arith.addf %4, %7 : vector<8x8xf32>
    %c0_8 = arith.constant 0 : index
    %c0_9 = arith.constant 0 : index
    %c0_10 = arith.constant 0 : index
    %9 = vector.load %arg4[%c0_8, %c0_9, %c0_10] : memref<1x32x8xf32, #tpu.memory_space<vmem>>, vector<1x32x8xf32>
    %10 = vector.shape_cast %9 : vector<1x32x8xf32> to vector<32x8xf32>
    %cst_11 = arith.constant dense<0.000000e+00> : vector<8x8xf32>
    %11 = tpu.matmul %1, %10, %cst_11 {dimension_numbers = #tpu.dot_dimension_numbers<[1], [0], [0], [1], [0, 0, 1, 1], [], []>} : vector<8x32xf32>, vector<32x8xf32>, vector<8x8xf32> -> vector<8x8xf32>
    %c0_12 = arith.constant 0 : index
    %c0_13 = arith.constant 0 : index
    %c0_14 = arith.constant 0 : index
    %12 = vector.load %arg5[%c0_12, %c0_13, %c0_14] : memref<1x32x8xf32, #tpu.memory_space<vmem>>, vector<1x32x8xf32>
    %13 = vector.shape_cast %12 : vector<1x32x8xf32> to vector<32x8xf32>
    %cst_15 = arith.constant dense<0.000000e+00> : vector<8x8xf32>
    %14 = tpu.matmul %1, %13, %cst_15 {dimension_numbers = #tpu.dot_dimension_numbers<[1], [0], [0], [1], [0, 0, 1, 1], [], []>} : vector<8x32xf32>, vector<32x8xf32>, vector<8x8xf32> -> vector<8x8xf32>
    %c0_16 = arith.constant 0 : index
    %c0_17 = arith.constant 0 : index
    %c0_18 = arith.constant 0 : index
    %15 = vector.load %arg7[%c0_16, %c0_17, %c0_18] : memref<1x1x8xf32, #tpu.memory_space<vmem>>, vector<1x1x8xf32>
    %16 = vector.shape_cast %15 : vector<1x1x8xf32> to vector<1x8xf32>
    %17 = vector.broadcast %16 : vector<1x8xf32> to vector<8x8xf32>
    %18 = arith.addf %14, %17 : vector<8x8xf32>
    %cst_19 = arith.constant dense<0.000000e+00> : vector<8x8xf32>
    %19 = tpu.matmul %8, %11, %cst_19 {dimension_numbers = #tpu.dot_dimension_numbers<[1], [1], [0], [0], [0, 0, 1, 0], [], []>} : vector<8x8xf32>, vector<8x8xf32>, vector<8x8xf32> -> vector<8x8xf32>
    %cst_20 = arith.constant dense<0xFF800000> : vector<8xf32>
    %20 = vector.multi_reduction <maximumf>, %19, %cst_20 [1] : vector<8x8xf32> to vector<8xf32>
    %21 = vector.shape_cast %20 : vector<8xf32> to vector<8x1xf32>
    %22 = vector.broadcast %21 : vector<8x1xf32> to vector<8x8xf32>
    %23 = arith.subf %19, %22 : vector<8x8xf32>
    %24 = math.exp %23 : vector<8x8xf32>
    %cst_21 = arith.constant dense<0.000000e+00> : vector<8xf32>
    %25 = vector.multi_reduction <add>, %24, %cst_21 [1] : vector<8x8xf32> to vector<8xf32>
    %26 = vector.shape_cast %25 : vector<8xf32> to vector<8x1xf32>
    %27 = tpu.reciprocal %26 {approx = true} : vector<8x1xf32> -> vector<8x1xf32>
    %28 = vector.broadcast %27 : vector<8x1xf32> to vector<8x8xf32>
    %29 = arith.mulf %24, %28 : vector<8x8xf32>
    %cst_22 = arith.constant dense<0.000000e+00> : vector<8x8xf32>
    %30 = tpu.matmul %29, %18, %cst_22 {dimension_numbers = #tpu.dot_dimension_numbers<[1], [0], [0], [1], [0, 0, 1, 1], [], []>} : vector<8x8xf32>, vector<8x8xf32>, vector<8x8xf32> -> vector<8x8xf32>
    %c0_23 = arith.constant 0 : index
    %c0_24 = arith.constant 0 : index
    %c0_25 = arith.constant 0 : index
    %31 = vector.load %arg8[%c0_23, %c0_24, %c0_25] : memref<1x8x32xf32, #tpu.memory_space<vmem>>, vector<1x8x32xf32>
    %32 = vector.shape_cast %31 : vector<1x8x32xf32> to vector<8x32xf32>
    %cst_26 = arith.constant dense<0.000000e+00> : vector<8x32xf32>
    %33 = tpu.matmul %30, %32, %cst_26 {dimension_numbers = #tpu.dot_dimension_numbers<[1], [0], [0], [1], [0, 0, 1, 1], [], []>} : vector<8x8xf32>, vector<8x32xf32>, vector<8x32xf32> -> vector<8x32xf32>
    %c0_i32 = arith.constant 0 : i32
    %34 = arith.cmpi eq, %arg1, %c0_i32 : i32
    %35 = arith.extui %34 : i1 to i32
    %c0_i32_27 = arith.constant 0 : i32
    %36 = arith.cmpi ne, %35, %c0_i32_27 : i32
    scf.if %36 {
      %cst_33 = arith.constant 0.000000e+00 : f32
      %43 = vector.broadcast %cst_33 : f32 to vector<8x32xf32>
      %c0_34 = arith.constant 0 : index
      %c0_35 = arith.constant 0 : index
      %44 = vector.load %arg11[%c0_34, %c0_35] : memref<8x32xf32, #tpu.memory_space<vmem>>, vector<8x32xf32>
      tpu.vector_store %arg11[%c0_34, %c0_35], %43 {strides = array<i32>} : memref<8x32xf32, #tpu.memory_space<vmem>>, vector<8x32xf32>,
    } else {
    }
    %c0_28 = arith.constant 0 : index
    %c0_29 = arith.constant 0 : index
    %37 = vector.load %arg11[%c0_28, %c0_29] : memref<8x32xf32, #tpu.memory_space<vmem>>, vector<8x32xf32>
    %38 = arith.addf %37, %33 : vector<8x32xf32>
    %c0_30 = arith.constant 0 : index
    %c0_31 = arith.constant 0 : index
    %39 = vector.load %arg11[%c0_30, %c0_31] : memref<8x32xf32, #tpu.memory_space<vmem>>, vector<8x32xf32>
    tpu.vector_store %arg11[%c0_30, %c0_31], %38 {strides = array<i32>} : memref<8x32xf32, #tpu.memory_space<vmem>>, vector<8x32xf32>,
    %c3_i32 = arith.constant 3 : i32
    %40 = arith.cmpi eq, %arg1, %c3_i32 : i32
    %41 = arith.extui %40 : i1 to i32
    %c0_i32_32 = arith.constant 0 : i32
    %42 = arith.cmpi ne, %41, %c0_i32_32 : i32
    scf.if %42 {
      %c0_33 = arith.constant 0 : index
      %c0_34 = arith.constant 0 : index
      %43 = vector.load %arg11[%c0_33, %c0_34] : memref<8x32xf32, #tpu.memory_space<vmem>>, vector<8x32xf32>
      %c0_35 = arith.constant 0 : index
      %c0_36 = arith.constant 0 : index
      %44 = vector.load %arg9[%c0_35, %c0_36] : memref<1x32xf32, #tpu.memory_space<vmem>>, vector<1x32xf32>
      %45 = vector.broadcast %44 : vector<1x32xf32> to vector<8x32xf32>
      %46 = arith.addf %43, %45 : vector<8x32xf32>
      %c0_37 = arith.constant 0 : index
      %c0_38 = arith.constant 0 : index
      %c0_39 = arith.constant 0 : index
      %47 = vector.load %arg10[%c0_37, %c0_38, %c0_39] : memref<1x8x32xf32, #tpu.memory_space<vmem>>, vector<1x8x32xf32>
      %48 = vector.shape_cast %47 : vector<1x8x32xf32> to vector<8x32xf32>
      %49 = vector.shape_cast %46 : vector<8x32xf32> to vector<1x8x32xf32>
      tpu.vector_store %arg10[%c0_37, %c0_38, %c0_39], %49 {strides = array<i32>} : memref<1x8x32xf32, #tpu.memory_space<vmem>>, vector<1x8x32xf32>,
    } else {
    }
    return
  }
  func.func @transform_0(%arg0: i32, %arg1: i32) -> (i32, i32, i32) {
    %c0_i32 = arith.constant 0 : i32
    %c0_i32_0 = arith.constant 0 : i32
    %c0_i32_1 = arith.constant 0 : i32
    return %arg0, %c0_i32, %c0_i32_0 : i32, i32, i32
  }
  func.func @transform_1(%arg0: i32, %arg1: i32) -> (i32, i32, i32) {
    %c0_i32 = arith.constant 0 : i32
    %c0_i32_0 = arith.constant 0 : i32
    %c0_i32_1 = arith.constant 0 : i32
    return %arg1, %c0_i32, %c0_i32_0 : i32, i32, i32
  }
  func.func @transform_2(%arg0: i32, %arg1: i32) -> (i32, i32, i32) {
    %c0_i32 = arith.constant 0 : i32
    %c0_i32_0 = arith.constant 0 : i32
    %c0_i32_1 = arith.constant 0 : i32
    return %arg1, %c0_i32, %c0_i32_0 : i32, i32, i32
  }
  func.func @transform_3(%arg0: i32, %arg1: i32) -> (i32, i32, i32) {
    %c0_i32 = arith.constant 0 : i32
    %c0_i32_0 = arith.constant 0 : i32
    %c0_i32_1 = arith.constant 0 : i32
    return %arg1, %c0_i32, %c0_i32_0 : i32, i32, i32
  }
  func.func @transform_4(%arg0: i32, %arg1: i32) -> (i32, i32, i32) {
    %c0_i32 = arith.constant 0 : i32
    %c0_i32_0 = arith.constant 0 : i32
    %c0_i32_1 = arith.constant 0 : i32
    return %arg1, %c0_i32, %c0_i32_0 : i32, i32, i32
  }
  func.func @transform_5(%arg0: i32, %arg1: i32) -> (i32, i32, i32) {
    %c0_i32 = arith.constant 0 : i32
    %c0_i32_0 = arith.constant 0 : i32
    %c0_i32_1 = arith.constant 0 : i32
    return %arg1, %c0_i32, %c0_i32_0 : i32, i32, i32
  }
  func.func @transform_6(%arg0: i32, %arg1: i32) -> (i32, i32, i32) {
    %c0_i32 = arith.constant 0 : i32
    %c0_i32_0 = arith.constant 0 : i32
    %c0_i32_1 = arith.constant 0 : i32
    return %arg1, %c0_i32, %c0_i32_0 : i32, i32, i32
  }
  func.func @transform_7(%arg0: i32, %arg1: i32) -> (i32, i32) {
    %c0_i32 = arith.constant 0 : i32
    %c0_i32_0 = arith.constant 0 : i32
    %c0_i32_1 = arith.constant 0 : i32
    return %c0_i32, %c0_i32_0 : i32, i32
  }
  func.func @transform_8(%arg0: i32, %arg1: i32) -> (i32, i32, i32) {
    %c0_i32 = arith.constant 0 : i32
    %c0_i32_0 = arith.constant 0 : i32
    %c0_i32_1 = arith.constant 0 : i32
    return %arg0, %c0_i32, %c0_i32_0 : i32, i32, i32
  }
}

</mosaic_0001>

<bundles_post_ra>
// kernel: attention_forward.1
= control target key start
LH: loop header
LB: loop body
LE: loop exit
PB: predicated region body
PF: predicated region fallthrough
CT: control target
= control target key end

     0   :  { %13 = vsyncpa [#allocation4], 0  ;;  %s1598_s0 = inlined_call_operand.vmem [shape: f32[2,8,32], index: 0, kind: input, shape index: {}]   ;;  %s1599_s1 = inlined_call_operand.vmem [shape: f32[4,32,8], index: 1, kind: input, shape index: {}]   ;;  %s1600_s2 = inlined_call_operand.vmem [shape: f32[4,32,8], index: 2, kind: input, shape index: {}]   ;;  %s1601_s3 = inlined_call_operand.vmem [shape: f32[4,32,8], index: 3, kind: input, shape index: {}]   ;;  %s1602_s4 = inlined_call_operand.vmem [shape: f32[4,1,8], index: 4, kind: input, shape index: {}]   ;;  %s1603_s5 = inlined_call_operand.vmem [shape: f32[4,1,8], index: 5, kind: input, shape index: {}]   ;;  %s1604_s6 = inlined_call_operand.vmem [shape: f32[4,8,32], index: 6, kind: input, shape index: {}]   ;;  %s1605_s7 = inlined_call_operand.vmem [shape: f32[1,32], index: 7, kind: input, shape index: {}]   ;;  %s1606_s8 = inlined_call_operand.hbm [shape: f32[2,8,32], index: 8, kind: output, shape index: {}]  }
   0x1   :  { %15 = vsyncpa [#allocation4 + $0x1], 0  ;;  %s1411_s27 = smov 0   ;;  %s1413_s28 = smov 0  }
   0x2   :  { %s1415_s29 = smov 0   ;;  %s1417_s30 = smov 0  }
   0x3   :  { %s1419_s9 = smov 0   ;;  %s1421_s10 = smov 0  }
   0x4   :  { %s1423_s11 = smov 0   ;;  %s1425_s12 = smov 0  }
   0x5 LB: > { %s1066_s13 = sadd.s32 4294967295, %s1359_s12   ;;  %s1067_s14 = sadd.s32 4294967294, %s1359_s12   ;;  %s1359_s12 = sphi %s1425_s12, %s21_s12   ;;  %s1355_s11 = sphi %s1423_s11, %s1622_s11   ;;  %s1351_s10 = sphi %s1421_s10, %s1621_s10   ;;  %s1347_s9 = sphi %s1419_s9, %s1620_s9   ;;  %s1343_s30 = sphi %s1417_s30, %s1619_s30   ;;  %s1339_s29 = sphi %s1415_s29, %s1618_s29   ;;  %s1335_s28 = sphi %s1413_s28, %s1617_s28   ;;  %s1331_s27 = sphi %s1411_s27, %s1616_s27  }
   0x6   : > { %s30_s15 = sadd.s32 1, %s1351_s10  ;;  %s33_s16 = sadd.s32 1, %s1355_s11 }
   0x7   : > { %p31_p0 = scmp.ge.s32.totalorder %s30_s15, 4  ;;  %p253_p1 = scmp.ne.s32.totalorder %s1339_s29, %s1335_s28 }
   0x8   : > { %p254_p2 = scmp.eq.s32.totalorder %s1066_s13, 7  ;;  %p259_p4 = scmp.ne.s32.totalorder %s1335_s28, %s1331_s27 }
   0x9   : > { %s1624_s15 = smov (%p31_p0, %s30_s15), 0  ;;  %s1626_s16 = smov (!%p31_p0, %s33_s16), %s1355_s11 }
   0xa   : > { %1609 = sst [smem:[#allocation6_spill]] %s1624_s15  ;;  %p1460_p3 = por %p254_p2, %p253_p1 }
   0xb   : > { %p35_p5 = scmp.ge.s32.totalorder %s1626_s16, 2  ;;  %p260_p6 = scmp.eq.s32.totalorder %s1067_s14, 7 }
   0xc   : > { %p1070_p7 = scmp.ge.s32.totalorder %s1359_s12, 1  ;;  %p331_p8 = scmp.lt.s32.totalorder %s1359_s12, 9 }
   0xd   : > { %s1628_s16 = smov (%p35_p5, %s1626_s16), 0  ;;  %p1470_p9 = por %p260_p6, %p259_p4 }
   0xe   : > { %1611 = sst [smem:[#allocation7_spill]] %s1628_s16  ;;  %p332_p10 = pnand %p1070_p7, %p331_p8 }
   0xf   : > { %s240_s19 = ssub.s32 %s1355_s11, %s1628_s16  ;;  %s243_s20 = sadd.s32 1, %s1339_s29  ;;  %v1361_v0 = vmov (!%p332_p10), 0.0|0.0   ;;  %vm1362_vm0 = vmmov (!%p332_p10), 0   ;;  %v1363_v1 = vmov (!%p332_p10), 0.0   ;;  %vm430_vm1 = vcmask (!%p332_p10), 261120  }
  0x10   : > { %p241_p11 = scmp.eq.s32.totalorder %s240_s19, 0  ;;  %335 = sbr.rel (%p332_p10) target bundleno = 1242 (0x4da), region = 52  ;;  %1174 = vmatprep.subr.bf16.mxu1 (!%p332_p10), %v1361_v0  ;;  %1168 = vmatprep.subr.bf16.mxu0 (!%p332_p10), %v1361_v0  ;;  %vm659_vm2 = vcmask (!%p332_p10), 64512  }
  0x11   : > { %s1607_s22 = sand.u32 (!%p332_p10), 1, %s1335_s28   ;;  %p393_p12 = scmp.lt.s32.totalorder (!%p332_p10), %s1343_s30, 3  ;;  %1139 = vmatprep.mubr.msk.f32.mxu1 (!%p332_p10), %vm1362_vm0, %v1363_v1  ;;  %1128 = vmatprep.mubr.msk.f32.mxu0 (!%p332_p10), %vm1362_vm0, %v1363_v1 }
  0x12   : > { %s1478_s21 = scalar_select %p241_p11, %s1339_s29, %s243_s20  }
  0x13   : > { %s1484_s23 = sshll.u32 (!%p332_p10), %s1607_s22, 3  ;;  %p389_p13 = scmp.lt.s32.totalorder (!%p332_p10), %s1347_s9, 1 }
  0x14   : > { %s388_s20 = scalar_lea.vmem (!%p332_p10), [#allocation3], %s1484_s23  ;;  %p1089_p0 = scmp.ne.s32.totalorder (!%p332_p10), %s1343_s30, 0 }
  0x17   : > { %s1490_s24 = scalar_select %p393_p12, %s1343_s30, 3 }
  0x18   : > { %s390_s25 = scalar_select %p389_p13, %s1347_s9, 1 }
  0x19   : > { %s1494_s26 = sshll.u32 %s1490_s24, 5  ;;  %v1364_v47 = vmov (!%p1089_p0), 0.0  }
  0x1a   : > { %s402_s19 = scalar_lea.vmem %s1600_s2, %s1494_s26  ;;  %s397_s16 = scalar_lea.vmem %s1599_s1, %s1494_s26  ;;  %898 = vst.msk [vmem:[#allocation2] sm:$0xff] (!%p1089_p0), %vm430_vm1, %v1364_v47 }
  0x1b   : > { %v504_v2 = vld [vmem:[%s402_s19] sm:$0xff]  ;;  %v505_v3 = vld [vmem:[%s402_s19 + $0x8] sm:$0xff]  ;;  %v506_v4 = vld [vmem:[%s402_s19 + $0x10] sm:$0xff]  ;;  %s1072_s15 = sshll.u32 %s390_s25, 3  ;;  %s407_s13 = scalar_lea.vmem %s1601_s3, %s1494_s26 }
  0x1c   : > { %v1175_v5 = vpack.c.bf16 %v505_v3, %v504_v2  ;;  %v419_v6 = vld [vmem:[%s397_s16] sm:$0xff]  ;;  %v420_v7 = vld [vmem:[%s397_s16 + $0x8] sm:$0xff]  ;;  %v507_v8 = vld [vmem:[%s402_s19 + $0x18] sm:$0xff]  ;;  %s392_s22 = scalar_lea.vmem %s1598_s0, %s1072_s15  ;;  %s410_s15 = scalar_lea.vmem %s1602_s4, %s1490_s24 }
  0x1d   : > { %v1169_v9 = vpack.c.bf16 %v420_v7, %v419_v6  ;;  %v421_v10 = vld [vmem:[%s397_s16 + $0x10] sm:$0xff]  ;;  %v422_v11 = vld [vmem:[%s397_s16 + $0x18] sm:$0xff]  ;;  %v1178_v12 = vpack.c.bf16 %v507_v8, %v506_v4  ;;  %v418_v14 = vld [vmem:[%s392_s22] sm:$0xff]  ;;  %s413_s22 = scalar_lea.vmem %s1603_s5, %s1490_s24  ;;  %s1079_s16 = sshll.u32 %s1490_s24, 3 }
  0x1e   : > { %1176 = vmatpush3.bf16.msra.mxu1 %v1175_v5  ;;  %v1172_v13 = vpack.c.bf16 %v422_v11, %v421_v10  ;;  %v1080_v15 = vld [vmem:[%s410_s15] ss:$0 sm:$0xff]  ;;  %v579_v22 = vld [vmem:[%s407_s13 + $0x8] sm:$0xff]  ;;  %v580_v23 = vld [vmem:[%s407_s13 + $0x10] sm:$0xff]  ;;  %s417_s19 = scalar_lea.vmem %s1604_s6, %s1079_s16 }
  0x1f   : > { %1170 = vmatpush3.bf16.msra.mxu0 %v1169_v9  ;;  %1177 = vmatprep.subr.bf16.mxu1 %v1361_v0  ;;  %v578_v21 = vld [vmem:[%s407_s13] sm:$0xff]  ;;  %v581_v25 = vld [vmem:[%s407_s13 + $0x18] sm:$0xff] }
  0x20   : > { %1171 = vmatprep.subr.bf16.mxu0 %v1361_v0  ;;  %v1181_v24 = vpack.c.bf16 %v579_v22, %v578_v21  ;;  %v1184_v26 = vpack.c.bf16 %v581_v25, %v580_v23  ;;  %v1083_v36 = vld [vmem:[%s413_s22] ss:$0 sm:$0xff] }
  0x21   : > { %v820_v39 = vld [vmem:[%s417_s19] sm:$0xff] }
  0x22   : > { %1179 = vmatpush3.bf16.msra.mxu1 %v1178_v12 }
  0x23   : > { %1173 = vmatpush3.bf16.msra.mxu0 %v1172_v13  ;;  %1153 = vmatprep.subr.mxu1 %v1363_v1 }
  0x24   : > { %1180 = vmatprep.subr.bf16.mxu0 %v1361_v0 }
  0x25   : > { %1140 = vmatmul.mubr.msk.f32.vlgmr.msra.gmra.mrb[0].mxu1 %vm430_vm1, %v418_v14 }
  0x26   : > { %1129 = vmatmul.mubr.msk.f32.vlgmr.msra.gmra.mrb[0].mxu0 %vm430_vm1, %v418_v14  ;;  %1155 = vmatprep.mubr.msk.f32.mxu1 %vm1362_vm0, %v1363_v1 }
  0x27   : > { %1150 = vmatprep.mubr.msk.f32.mxu0 %vm1362_vm0, %v1363_v1  ;;  %1182 = vmatpush3.bf16.msra.mxu0 %v1181_v24 }
  0x28   : > { %1183 = vmatprep.subr.bf16.mxu0 %v1361_v0 }
  0x2b   : > { %1185 = vmatpush3.bf16.msra.mxu0 %v1184_v26 }
  0x2c   : > { %1163 = vmatprep.subr.mxu0 %v1363_v1 }
  0x2e   : > { %1151 = vmatmul.mubr.msk.f32.vlgmr.msra.gmra.mrb[2].mxu0 %vm430_vm1, %v418_v14 }
  0x2f   : > { %1165 = vmatprep.mubr.msk.f32.mxu0 %vm1362_vm0, %v1363_v1  ;;  %1164 = vmatpush3.msra.mxu0 %v820_v39 }
  0xf8   : > { %v574_v16 = vpop.f32.mrb[0].mxu1 }
  0xf9   : > { %v500_v17 = vpop.f32.mrb[0].mxu0  ;;  %v1141_v18 = vpop.f32.mrb[1].mxu1  ;;  %1154 = vmatpush3.xpose.msk.msra.mxu1 %vm659_vm2, %v574_v16 }
  0xfa   : > { %v501_v19 = vadd.f32 %v1080_v15, %v500_v17  ;;  %v1130_v20 = vpop.f32.mrb[1].mxu0  ;;  %1158 = vmatprep.subr.mxu1 %v1363_v1 }
  0xfc   : > { %1156 = vmatmul.mubr.msk.f32.vlgmr.msra.gmra.mrb[2].mxu1 %vm659_vm2, %v501_v19 }
  0xfd   : > { %1160 = vmatprep.mubr.msk.f32.mxu1 %vm1362_vm0, %v1363_v1 }
 0x101   : > { %v655_v35 = vpop.f32.mrb[2].mxu0 }
 0x102   : > { %v1152_v37 = vpop.f32.mrb[3].mxu0  ;;  %v656_v38 = vadd.f32 %v1083_v36, %v655_v35 }
 0x104   : > { %1159 = vmatpush3.msra.mxu1 %v656_v38 }
 0x1cf   : > { %v732_v27 = vpop.f32.mrb[2].mxu1 }
 0x1d0   : > { %v1157_v28 = vpop.f32.mrb[3].mxu1  ;;  %v736_v29 = vsel %vm659_vm2, %v732_v27, -inf }
 0x1d1   : > { %737 = vmax.xlane.f32.xlu0 %v736_v29 }
 0x25e   : > { %v738_v30 = vpop.xlane.xlu0 %737 }
 0x25f   : > { %v739_v31 = vsub.f32 %v732_v27, %v738_v30 }
 0x261   : > { %v740_v32 = vmul.f32 1.442695, %v739_v31 }
 0x263   : > { %1261 = vpow2.f32 %v740_v32 }
 0x26d   : > { %v1262_v33 = vpop.eup %1261 }
 0x26e   : > { %v742_v34 = vsel %vm659_vm2, %v1262_v33, 0.0 }
 0x26f   : > { %743 = vadd.xlane.f32.xlu0 %v742_v34 }
 0x2fc   : > { %v744_v40 = vpop.xlane.xlu0 %743 }
 0x2fd   : > { %1263 = vrcp.f32 %v744_v40 }
 0x307   : > { %v1264_v41 = vpop.eup %1263 }
 0x308   : > { %v746_v42 = vmul.f32 %v1264_v41, %v1262_v33 }
 0x30a   : > { %1161 = vmatmul.mubr.msk.f32.vlgmr.msra.gmra.mrb[4].mxu1 %vm659_vm2, %v746_v42 }
 0x3dd   : > { %v816_v43 = vpop.f32.mrb[4].mxu1 }
 0x3de   : > { %v1162_v44 = vpop.f32.mrb[5].mxu1  ;;  %1166 = vmatmul.mubr.msk.f32.vlgmr.msra.gmra.mrb[4].mxu0 %vm659_vm2, %v816_v43 }
 0x4ac   : > { %897 = sbr.rel (%p1089_p0) target bundleno = 1203 (0x4b3), region = 56 }
 0x4b1   : > { %v890_v45 = vpop.f32.mrb[4].mxu0 }
 0x4b2   : > { %v1167_v46 = vpop.f32.mrb[5].mxu0 }
 0x4b3 PF: > { %v899_v48 = vld [vmem:[#allocation2] sm:$0xff]  ;;  %p1090_p1 = scmp.ne.s32.totalorder %s1343_s30, 3 }
 0x4b4   : > { %v900_v49 = vadd.f32 %v899_v48, %v890_v45  ;;  %v1091_v51 = vld [vmem:[%s1605_s7] ss:$0 sm:$0xff] (!%p1090_p1) }
 0x4b5   : > { %905 = sbr.rel (%p1090_p1) target bundleno = 1217 (0x4c1), region = 60 }
 0x4b6   : > { %901 = vst.msk [vmem:[#allocation2] sm:$0xff] %vm430_vm1, %v900_v49 }
 0x4bd   : > { %v906_v50 = vld [vmem:[#allocation2] sm:$0xff] }
 0x4be   : > { %v914_v52 = vadd.f32 %v1091_v51, %v906_v50 }
 0x4c0   : > { %915 = vst.msk [vmem:[%s388_s20] sm:$0xff] %vm430_vm1, %v914_v52 }
 0x4c1 PF: > { %s1093_s23 = sshll.u32 %s1347_s9, 7  ;;  %s930_s30 = sshll.u32 %s388_s20, 4  ;;  %s931_s30 = int_to_ptr.vmem [resolvable:$true] %s930_s30 }
 0x4c2   : > { %s1549_s22 = scalar_lea.hbm %s1606_s8, %s1093_s23  ;;  %s1613_s16 = sand.u32 1, %s1335_s28  }
 0x4c3   : > { %s917_s25 = scalar_lea.sflag [#allocation4], %s1613_s16  ;;  %s1265_s15 = scalar_lea.vmem %s931_s30, 128 }
 0x4c4   : > { %p1266_p2 = scmp.ne.s32.totalorder %s931_s30, %s1265_s15  ;;  %s1365_s19 = smov [#allocation3]  }
 0x4c5   : > { %s1269_s24 = sshll.u32 %s1365_s19, 4  ;;  %s1270_s24 = int_to_ptr.vmem [resolvable:$false] %s1269_s24 }
 0x4c6   : > { %p1267_p4 = pnand %p1266_p2, %p1460_p3  ;;  %s1271_s13 = scalar_lea.vmem %s1270_s24, 256 }
 0x4c7   : > { %p1272_p6 = scmp.lt.s32.totalorder %s931_s30, %s1270_s24  ;;  %p1273_p7 = scmp.lt.s32.totalorder %s1271_s13, %s1265_s15 }
 0x4c8   : > { %p1268_p5 = pneg %p1267_p4 }
 0x4c9   : > { %p1274_p8 = por %p1273_p7, %p1272_p6 }
 0x4cb   : > { %p1275_p10 = pnand %p1274_p8, %p1268_p5 }
 0x4cd   : > { %1278 = shalt.err (!%p1275_p10)
}
 0x4ce   : > { %s1279_s9 = scalar_lea.hbm %s1549_s22, 128  ;;  %s1283_s26 = scalar_lea.hbm %s1606_s8, 256 }
 0x4cf   : > { %p1280_p11 = scmp.ne.s32.totalorder %s1549_s22, %s1279_s9  ;;  %p1284_p0 = scmp.lt.u32.totalorder %s1549_s22, %s1606_s8 }
 0x4d0   : > { %p1285_p1 = scmp.lt.u32.totalorder %s1283_s26, %s1279_s9  ;;  %p1287_p4 = scmp.lt.u32.totalorder %s1279_s9, %s1549_s22 }
 0x4d1   : > { %p1281_p12 = pnand %p1280_p11, %p1460_p3 }
 0x4d2   : > { %p1286_p2 = por %p1285_p1, %p1284_p0 }
 0x4d3   : > { %p1282_p13 = pneg %p1281_p12 }
 0x4d4   : > { %p1288_p5 = por %p1287_p4, %p1286_p2 }
 0x4d6   : > { %p1289_p6 = pnand %p1288_p5, %p1282_p13 }
 0x4d8   : > { %1292 = shalt.err (!%p1289_p6)
}
 0x4d9   : > { %1186 = dma.vmem_to_hbm [thread:$0]  (%p1460_p3), %s931_s30, 128, %s1549_s22, %s917_s25  }
 0x4da PF: > { %p1192_p7 = scmp.ge.s32.totalorder %s1359_s12, 2  ;;  %s942_s15 = sand.u32 1, %s1331_s27  }
 0x4db   : > { %s943_s19 = scalar_lea.sflag [#allocation4], %s942_s15 }
 0x4dc   : > { %p1189_p8 = pnand %p1192_p7, %p1470_p9 }
 0x4de   : > { %1326 = dma.done.wait (!%p1189_p8), %s943_s19, 128  }
 0x4df   : > { %1328 = vsyncadd (!%p1189_p8), %s943_s19, 4294967168  ;;  %s21_s12 = sadd.s32 1, %s1359_s12   ;;  %s1614_s17 = sld [smem:[#allocation6_spill]] }
 0x4e0   : > { %p18_p10 = scmp.ge.s32.totalorder %s21_s12, 10   ;;  %s1615_s22 = sld [smem:[#allocation7_spill]] }
 0x4e1   : > { %s1616_s27 = smov %s1335_s28  ;;  %s1617_s28 = smov %s1339_s29 }
 0x4e2   : > { %s1618_s29 = smov %s1478_s21  ;;  %s1619_s30 = smov %s1351_s10 }
 0x4e3   : > { %s1620_s9 = smov %s1355_s11  ;;  %20 = sbr.rel (!%p18_p10) target bundleno = 5 (0x5), region = 113 }
 0x4e5   : > { %s1621_s10 = smov %s1614_s17 }
 0x4e6   : > { %s1622_s11 = smov %s1615_s22 }
 0x4ea   :  { %948 = vsyncpa [#allocation4], 1 }
 0x4eb   :  { %950 = vsyncpa [#allocation4 + $0x1], 1 }

</bundles_post_ra>
